<compile_context>
chip_gen: v6e
topology: v6e:2x2x1
jax: 0.10.0
libtpu: 0.0.40
codegen_flags: <defaults>
</compile_context>

<pallas_src>
import functools

import jax
import jax.numpy as jnp
from jax.experimental import pallas as pl
from jax.experimental.pallas import tpu as pltpu


_LANE = 128


def _round_up(x, m):
    return ((x + m - 1) // m) * m


def _pad_to(a, shape):
    pads = [(0, t - s) for s, t in zip(a.shape, shape)]
    return jnp.pad(a, pads)


def _vmem_limit_bytes():
    """0.8 * physical VMEM: ~51 MiB on v7x (64 MiB/TC), ~102 MiB on v5e/v6e (128 MiB)."""
    cap = None
    try:
        cap = getattr(pltpu.get_tpu_info(), "vmem_capacity_bytes", None)
    except Exception:  # pragma: no cover - conservative fallback if query fails
        cap = None
    if not cap:
        cap = 64 * 1024 * 1024  # conservative: v7x per-TensorCore VMEM
    return int(cap * 0.8)


def _pick_tiles(n_pad, k_rest, out_pad, spow_bytes, xw_bytes, out_bytes, budget):
    """Largest (row_tile, col_tile) whose double-buffered blocks fit `budget`.

    row_tile: multiple of 16 dividing n_pad with >= 2 row tiles (v7x megacore).
    col_tile: multiple of 128 dividing n_pad (lane-dense Spow blocks).
    """
    def cands(unit):
        return sorted({d for d in range(unit, n_pad + 1, unit) if n_pad % d == 0},
                      reverse=True)

    row_cands = [r for r in cands(16) if n_pad // r >= 2] or [n_pad]
    col_cands = cands(128) or [n_pad]

    def need(rt, ct):
        return (2 * k_rest * rt * ct * spow_bytes        # streamed Spow block (dbl-buf)
                + 2 * k_rest * ct * out_pad * xw_bytes   # XW[1:] block (dbl-buf)
                + 2 * rt * out_pad * 4                   # XW0 block, f32 (dbl-buf)
                + 2 * rt * out_pad * out_bytes           # output block (dbl-buf)
                + rt * out_pad * 4)                      # f32 accumulator scratch

    pairs = sorted(((rt, ct) for rt in row_cands for ct in col_cands),
                   key=lambda p: (min(p), p[0] * p[1]), reverse=True)
    for rt, ct in pairs:
        if need(rt, ct) <= budget:
            return rt, ct
    return pairs[-1]  # smallest pair; always tiny


def _gcnh_layer_kernel(spow_ref, xw_ref, xw0_ref, o_ref, acc_ref, *,
                       apply_tanh, k_rest):
    """acc[rows] = XW0[rows] + sum_k Spow[k][rows, cols] @ XW[k][cols, :]."""
    j = pl.program_id(1)  # contraction step over N

    @pl.when(j == 0)
    def _():
        # Identity power: Spow[0] == I  =>  contribution is (x @ W[0])[rows].
        acc_ref[...] = xw0_ref[...].astype(jnp.float32)

    # K is small -> static unroll over the non-identity powers; each iteration is
    # one (row_tile, col_tile) @ (col_tile, out_pad) MXU matmul, f32 accumulation.
    for k in range(k_rest):
        acc_ref[...] += jnp.dot(spow_ref[k], xw_ref[k],
                                preferred_element_type=jnp.float32)

    @pl.when(j == pl.num_programs(1) - 1)
    def _():
        out = acc_ref[...]
        if apply_tanh:
            out = jnp.tanh(out)          # f32 tanh (safe on v5e too)
        o_ref[...] = out.astype(o_ref.dtype)


def gcnh_layer(spow_rest, xw_rest, xw0, *, apply_tanh, out_dtype):
    """One GCNH layer given hoisted XW = x @ W.

    spow_rest: (K-1, N_pad, N_pad) non-identity powers (compute dtype, e.g. bf16)
    xw_rest  : (K-1, N_pad, out_pad) = x @ W[1:]       (compute dtype)
    xw0      : (N_pad, out_pad)      = x @ W[0]        (f32, identity-power term)
    """
    k_rest, n_pad, _ = spow_rest.shape
    out_pad = xw0.shape[-1]

    vmem_limit = _vmem_limit_bytes()
    row_tile, col_tile = _pick_tiles(
        n_pad, k_rest, out_pad,
        spow_rest.dtype.itemsize, xw_rest.dtype.itemsize,
        jnp.dtype(out_dtype).itemsize,
        budget=int(vmem_limit * 0.7))
    grid = (n_pad // row_tile, n_pad // col_tile)

    kernel = functools.partial(_gcnh_layer_kernel,
                               apply_tanh=apply_tanh, k_rest=k_rest)

    return pl.pallas_call(
        kernel,
        out_shape=jax.ShapeDtypeStruct((n_pad, out_pad), out_dtype),
        grid_spec=pltpu.PrefetchScalarGridSpec(
            num_scalar_prefetch=0,
            grid=grid,
            in_specs=[
                # Streamed (row, col) tile of all K-1 non-identity powers of S.
                pl.BlockSpec((k_rest, row_tile, col_tile), lambda i, j: (0, i, j)),
                # Matching contraction rows of XW[1:].
                pl.BlockSpec((k_rest, col_tile, out_pad), lambda i, j: (0, j, 0)),
                # Identity-power term (changes only with the row tile).
                pl.BlockSpec((row_tile, out_pad), lambda i, j: (i, 0)),
            ],
            out_specs=pl.BlockSpec((row_tile, out_pad), lambda i, j: (i, 0)),
            scratch_shapes=[pltpu.VMEM((row_tile, out_pad), jnp.float32)],
        ),
        compiler_params=pltpu.CompilerParams(
            dimension_semantics=("parallel", "arbitrary"),
            vmem_limit_bytes=vmem_limit),
    )(spow_rest, xw_rest, xw0)


def _layer_xw(x_pad, w_pad):
    """XW[k] = x @ W[k] for all k, as ONE wide matmul (full MXU column fill)."""
    K, in_pad, out_pad = w_pad.shape
    w_wide = jnp.transpose(w_pad, (1, 0, 2)).reshape(in_pad, K * out_pad)
    xw = jnp.dot(x_pad.astype(jnp.float32), w_wide,
                 precision=jax.lax.Precision.HIGHEST)
    return xw.reshape(-1, K, out_pad).transpose(1, 0, 2)  # (K, N_pad, out_pad) f32


def gcnh_forward(spow, weights, x, *, compute_dtype=jnp.bfloat16):
    """GCNH forward: tanh between layers, no activation on the last layer."""
    K, N, _ = spow.shape
    n_layers = len(weights)
    dims = [weights[0].shape[1]] + [w.shape[2] for w in weights]
    pdims = [_round_up(d, _LANE) for d in dims]   # lane-dense feature dims
    n_pad = _round_up(N, _LANE)                   # lane/sublane-friendly node dim

    x_pad = _pad_to(x.astype(jnp.float32), (n_pad, pdims[0]))

    # Non-identity powers: padded + cast to the streaming dtype ONCE (shared by
    # all layers).  K == 1 needs no Spow at all (Spow == [I]).
    spow_rest = None
    if K >= 2:
        spow_rest = _pad_to(spow[1:], (K - 1, n_pad, n_pad)).astype(compute_dtype)

    for i, w in enumerate(weights):
        apply_tanh = i < n_layers - 1
        w_pad = _pad_to(w.astype(jnp.float32), (K, pdims[i], pdims[i + 1]))
        xw_all = _layer_xw(x_pad, w_pad)          # (K, n_pad, out_pad), f32
        xw0 = xw_all[0]                           # identity-power contribution

        if K == 1:
            # Degenerate dense layer: out = x @ W[0]; no graph mixing, no kernel.
            out = jnp.tanh(xw0) if apply_tanh else xw0
            x_pad = out.astype(compute_dtype if apply_tanh else jnp.float32)
            continue

        out_dtype = compute_dtype if apply_tanh else jnp.float32
        x_pad = gcnh_layer(spow_rest, xw_all[1:].astype(compute_dtype), xw0,
                           apply_tanh=apply_tanh, out_dtype=out_dtype)

    return x_pad[:N, :dims[-1]].astype(jnp.float32)


# ------------------------- glue / reference / test -------------------------

def make_spow(A, K):
    """S <- D^-1/2 (A + I) D^-1/2; Spow[k] = S^k with Spow[0] = I (matches torch)."""
    N = A.shape[0]
    S = A + jnp.eye(N, dtype=A.dtype)
    d = S.sum(1)
    D_inv = jnp.diag(1.0 / jnp.sqrt(d))
    S = D_inv @ S @ D_inv
    pows = [jnp.eye(N, dtype=A.dtype)]
    for _ in range(1, K):
        pows.append(pows[-1] @ S)
    return jnp.stack(pows, axis=0)  # (K, N, N)


def init_weights(key, K, in_dim, out_dim):
    """Kaiming-uniform-like init for W of shape (K, in, out) (torch fan-in conv.)."""
    fan_in = in_dim * out_dim
    bound = jnp.sqrt(6.0 / fan_in)
    return jax.random.uniform(key, (K, in_dim, out_dim), dtype=jnp.float32,
                              minval=-bound, maxval=bound)


def gcnh_reference(spow, weights, x):
    """Pure-JAX reference (high-precision matmuls) for correctness checking."""
    n_layers = len(weights)
    for i, W in enumerate(weights):
        out = jnp.einsum('knm,mi,kio->no', spow, x, W,
                         precision=jax.lax.Precision.HIGHEST)
        x = jnp.tanh(out) if i < n_layers - 1 else out
    return x


if __name__ == "__main__":
    key = jax.random.PRNGKey(0)
    N, in_dim, hid_dim, out_dim, K, n_layers = 16, 8, 32, 4, 3, 2

    k_adj, k_x, *k_w = jax.random.split(key, 2 + n_layers)

    # Synthetic symmetric adjacency (no self loops; layer adds them).
    A = (jax.random.uniform(k_adj, (N, N)) < 0.3).astype(jnp.float32)
    A = jnp.maximum(A, A.T)
    A = A * (1.0 - jnp.eye(N, dtype=jnp.float32))

    spow = make_spow(A, K)  # (K, N, N), shared by all layers (same S)

    dims = [in_dim] + [hid_dim] * (n_layers - 1) + [out_dim]
    weights = [init_weights(k_w[i], K, dims[i], dims[i + 1])
               for i in range(n_layers)]

    x = jax.random.normal(k_x, (N, in_dim), dtype=jnp.float32)

    ref = gcnh_reference(spow, weights, x)

    # f32 streaming path (near-exact).
    out_f32 = jax.block_until_ready(
        gcnh_forward(spow, weights, x, compute_dtype=jnp.float32))
    assert out_f32.shape == (N, out_dim)
    assert jnp.allclose(out_f32, ref, atol=1e-3, rtol=1e-3), \
        float(jnp.max(jnp.abs(out_f32 - ref)))

    # Default bf16 streaming path (f32 accumulation), as used on v5e/v6e/v7x.
    out_bf16 = jax.block_until_ready(gcnh_forward(spow, weights, x))
    assert out_bf16.shape == (N, out_dim)
    assert jnp.allclose(out_bf16, ref, atol=5e-2, rtol=5e-2), \
        float(jnp.max(jnp.abs(out_bf16 - ref)))

    print("KERNEL_OK")
</pallas_src>

<mosaic_0001>
module attributes {stable_mosaic.version = 11 : i64} {
  func.func @_gcnh_layer_kernel(%arg0: i32, %arg1: i32, %arg2: memref<2x64x128xf32, #tpu.memory_space<vmem>>, %arg3: memref<2x128x128xf32, #tpu.memory_space<vmem>>, %arg4: memref<64x128xf32, #tpu.memory_space<vmem>>, %arg5: memref<64x128xf32, #tpu.memory_space<vmem>>, %arg6: memref<64x128xf32, #tpu.memory_space<vmem>>) attributes {dimension_semantics = [#tpu.dimension_semantics<parallel>, #tpu.dimension_semantics<arbitrary>], iteration_bounds = array<i64: 2, 1>, scalar_prefetch = 0 : i64, scratch_operands = 1 : i64, tpu.core_type = #tpu.core_type<tc>, window_params = [{transform_indices = @transform_0, window_bounds = array<i64: 2, 64, 128>}, {transform_indices = @transform_1, window_bounds = array<i64: 2, 128, 128>}, {transform_indices = @transform_2, window_bounds = array<i64: 64, 128>}, {transform_indices = @transform_3, window_bounds = array<i64: 64, 128>}]} {
    %c0_i32 = arith.constant 0 : i32
    %0 = arith.cmpi eq, %arg1, %c0_i32 : i32
    %1 = arith.extui %0 : i1 to i32
    %c0_i32_0 = arith.constant 0 : i32
    %2 = arith.cmpi ne, %1, %c0_i32_0 : i32
    scf.if %2 {
      %c0_22 = arith.constant 0 : index
      %c0_23 = arith.constant 0 : index
      %22 = vector.load %arg4[%c0_22, %c0_23] : memref<64x128xf32, #tpu.memory_space<vmem>>, vector<64x128xf32>
      %c0_24 = arith.constant 0 : index
      %c0_25 = arith.constant 0 : index
      %23 = vector.load %arg6[%c0_24, %c0_25] : memref<64x128xf32, #tpu.memory_space<vmem>>, vector<64x128xf32>
      tpu.vector_store %arg6[%c0_24, %c0_25], %22 {strides = array<i32>} : memref<64x128xf32, #tpu.memory_space<vmem>>, vector<64x128xf32>,
    } else {
    }
    %c0 = arith.constant 0 : index
    %c0_1 = arith.constant 0 : index
    %3 = vector.load %arg6[%c0, %c0_1] : memref<64x128xf32, #tpu.memory_space<vmem>>, vector<64x128xf32>
    %c0_2 = arith.constant 0 : index
    %c0_3 = arith.constant 0 : index
    %c0_4 = arith.constant 0 : index
    %4 = vector.load %arg2[%c0_2, %c0_3, %c0_4] : memref<2x64x128xf32, #tpu.memory_space<vmem>>, vector<1x64x128xf32>
    %5 = vector.shape_cast %4 : vector<1x64x128xf32> to vector<64x128xf32>
    %c0_5 = arith.constant 0 : index
    %c0_6 = arith.constant 0 : index
    %c0_7 = arith.constant 0 : index
    %6 = vector.load %arg3[%c0_5, %c0_6, %c0_7] : memref<2x128x128xf32, #tpu.memory_space<vmem>>, vector<1x128x128xf32>
    %7 = vector.shape_cast %6 : vector<1x128x128xf32> to vector<128x128xf32>
    %cst = arith.constant dense<0.000000e+00> : vector<64x128xf32>
    %8 = tpu.matmul %5, %7, %cst {dimension_numbers = #tpu.dot_dimension_numbers<[1], [0], [0], [1], [0, 0, 1, 1], [], []>} : vector<64x128xf32>, vector<128x128xf32>, vector<64x128xf32> -> vector<64x128xf32>
    %9 = arith.addf %3, %8 : vector<64x128xf32>
    %c0_8 = arith.constant 0 : index
    %c0_9 = arith.constant 0 : index
    %10 = vector.load %arg6[%c0_8, %c0_9] : memref<64x128xf32, #tpu.memory_space<vmem>>, vector<64x128xf32>
    tpu.vector_store %arg6[%c0_8, %c0_9], %9 {strides = array<i32>} : memref<64x128xf32, #tpu.memory_space<vmem>>, vector<64x128xf32>,
    %c0_10 = arith.constant 0 : index
    %c0_11 = arith.constant 0 : index
    %11 = vector.load %arg6[%c0_10, %c0_11] : memref<64x128xf32, #tpu.memory_space<vmem>>, vector<64x128xf32>
    %c1 = arith.constant 1 : index
    %c0_12 = arith.constant 0 : index
    %c0_13 = arith.constant 0 : index
    %12 = vector.load %arg2[%c1, %c0_12, %c0_13] : memref<2x64x128xf32, #tpu.memory_space<vmem>>, vector<1x64x128xf32>
    %13 = vector.shape_cast %12 : vector<1x64x128xf32> to vector<64x128xf32>
    %c1_14 = arith.constant 1 : index
    %c0_15 = arith.constant 0 : index
    %c0_16 = arith.constant 0 : index
    %14 = vector.load %arg3[%c1_14, %c0_15, %c0_16] : memref<2x128x128xf32, #tpu.memory_space<vmem>>, vector<1x128x128xf32>
    %15 = vector.shape_cast %14 : vector<1x128x128xf32> to vector<128x128xf32>
    %cst_17 = arith.constant dense<0.000000e+00> : vector<64x128xf32>
    %16 = tpu.matmul %13, %15, %cst_17 {dimension_numbers = #tpu.dot_dimension_numbers<[1], [0], [0], [1], [0, 0, 1, 1], [], []>} : vector<64x128xf32>, vector<128x128xf32>, vector<64x128xf32> -> vector<64x128xf32>
    %17 = arith.addf %11, %16 : vector<64x128xf32>
    %c0_18 = arith.constant 0 : index
    %c0_19 = arith.constant 0 : index
    %18 = vector.load %arg6[%c0_18, %c0_19] : memref<64x128xf32, #tpu.memory_space<vmem>>, vector<64x128xf32>
    tpu.vector_store %arg6[%c0_18, %c0_19], %17 {strides = array<i32>} : memref<64x128xf32, #tpu.memory_space<vmem>>, vector<64x128xf32>,
    %c0_i32_20 = arith.constant 0 : i32
    %19 = arith.cmpi eq, %arg1, %c0_i32_20 : i32
    %20 = arith.extui %19 : i1 to i32
    %c0_i32_21 = arith.constant 0 : i32
    %21 = arith.cmpi ne, %20, %c0_i32_21 : i32
    scf.if %21 {
      %c0_22 = arith.constant 0 : index
      %c0_23 = arith.constant 0 : index
      %22 = vector.load %arg6[%c0_22, %c0_23] : memref<64x128xf32, #tpu.memory_space<vmem>>, vector<64x128xf32>
      %23 = math.tanh %22 : vector<64x128xf32>
      %c0_24 = arith.constant 0 : index
      %c0_25 = arith.constant 0 : index
      %24 = vector.load %arg5[%c0_24, %c0_25] : memref<64x128xf32, #tpu.memory_space<vmem>>, vector<64x128xf32>
      tpu.vector_store %arg5[%c0_24, %c0_25], %23 {strides = array<i32>} : memref<64x128xf32, #tpu.memory_space<vmem>>, vector<64x128xf32>,
    } else {
    }
    return
  }
  func.func @transform_0(%arg0: i32, %arg1: i32) -> (i32, i32, i32) {
    %c0_i32 = arith.constant 0 : i32
    %c0_i32_0 = arith.constant 0 : i32
    return %c0_i32, %arg0, %arg1 : i32, i32, i32
  }
  func.func @transform_1(%arg0: i32, %arg1: i32) -> (i32, i32, i32) {
    %c0_i32 = arith.constant 0 : i32
    %c0_i32_0 = arith.constant 0 : i32
    %c0_i32_1 = arith.constant 0 : i32
    return %c0_i32, %arg1, %c0_i32_0 : i32, i32, i32
  }
  func.func @transform_2(%arg0: i32, %arg1: i32) -> (i32, i32) {
    %c0_i32 = arith.constant 0 : i32
    %c0_i32_0 = arith.constant 0 : i32
    return %arg0, %c0_i32 : i32, i32
  }
  func.func @transform_3(%arg0: i32, %arg1: i32) -> (i32, i32) {
    %c0_i32 = arith.constant 0 : i32
    %c0_i32_0 = arith.constant 0 : i32
    return %arg0, %c0_i32 : i32, i32
  }
}

</mosaic_0001>

<bundles_post_ra>
// kernel: tpu_custom_call.1
= control target key start
LH: loop header
LB: loop body
LE: loop exit
PB: predicated region body
PF: predicated region fallthrough
CT: control target
= control target key end

     0   :  { %s1446_s0 = inlined_call_operand.hbm [shape: f32[2,128,128], index: 0, kind: input, shape index: {}]   ;;  %s1447_s1 = inlined_call_operand.hbm [shape: f32[2,128,128], index: 1, kind: input, shape index: {}]   ;;  %s1448_s2 = inlined_call_operand.hbm [shape: f32[128,128], index: 2, kind: input, shape index: {}]   ;;  %s1449_s3 = inlined_call_operand.hbm [shape: f32[128,128], index: 3, kind: output, shape index: {}]  }
   0x1   :  { %1455 = sst [smem:[#allocation21_spill]] %s1446_s0 }
   0x2   :  { %1456 = sst [smem:[#allocation22_spill]] %s1447_s1 }
   0x3   :  { %8 = vsyncpa [#allocation4], 0 }
   0x4   :  { %10 = vsyncpa [#allocation4 + $0x1], 0 }
   0x5   :  { %11 = vsyncpa [#allocation7], 0 }
   0x6   :  { %12 = vsyncpa [#allocation5], 0 }
   0x7   :  { %14 = vsyncpa [#allocation5 + $0x1], 0  ;;  %s1227_s12 = smov 0   ;;  %s1229_s13 = smov 0  }
   0x8   :  { %s1231_s14 = smov 0   ;;  %s1233_s15 = smov 0  }
   0x9   :  { %s1235_s16 = smov 0   ;;  %s1237_s17 = smov 0  }
   0xa LB: > { %1457 = sst [smem:[#allocation17_spill]] %s1179_s14  ;;  %s1258_s18 = sadd.s32 4294967295, %s1191_s17   ;;  %s1191_s17 = sphi %s1237_s17, %s20_s17   ;;  %s1187_s16 = sphi %s1235_s16, %s1474_s16   ;;  %s1183_s15 = sphi %s1233_s15, %s1473_s15   ;;  %s1179_s14 = sphi %s1231_s14, %s1472_s14   ;;  %s1175_s13 = sphi %s1229_s13, %s1476_s13   ;;  %s1171_s12 = sphi %s1227_s12, %s1475_s12  }
   0xb   : > { %1458 = sst [smem:[#allocation18_spill]] %s1187_s16  ;;  %s778_s19 = sadd.s32 4294967294, %s1191_s17  }
   0xc   : > { %s32_s20 = sadd.s32 1, %s1187_s16  ;;  %s41_s21 = sadd.s32 1, %s1179_s14 }
   0xd   : > { %p34_p0 = scmp.ge.s32.totalorder %s32_s20, 2  ;;  %p48_p1 = scmp.ne.s32.totalorder %s1179_s14, %s1175_s13 }
   0xe   : > { %p49_p2 = scmp.eq.s32.totalorder %s1191_s17, 0  ;;  %p54_p3 = scmp.ne.s32.totalorder %s1175_s13, %s1171_s12 }
   0xf   : > { %s1478_s20 = smov (%p34_p0, %s32_s20), 0  ;;  %p55_p5 = scmp.eq.s32.totalorder %s1258_s18, 0 }
  0x10   : > { %1459 = sst [smem:[#allocation19_spill]] %s1478_s20  ;;  %p1270_p4 = por %p49_p2, %p48_p1 }
  0x11   : > { %s36_s23 = ssub.s32 %s1187_s16, %s1478_s20  ;;  %p130_p6 = scmp.eq.s32.totalorder %s1258_s18, 1 }
  0x12   : > { %p39_p7 = scmp.eq.s32.totalorder %s36_s23, 0  ;;  %p1280_p8 = por %p55_p5, %p54_p3 }
  0x13   : > { %p1284_p9 = por %p130_p6, %p48_p1  ;;  %p136_p10 = scmp.eq.s32.totalorder %s778_s19, 1 }
  0x14   : > { %s1461_s24 = scalar_select %p1280_p8, 1, 0 }
  0x15   : > { %s1462_s25 = scalar_select %p1284_p9, 1, 0 }
  0x16   : > { %s1289_s26 = scalar_select %p39_p7, %s1179_s14, %s41_s21  }
  0x17   : > { %p1291_p11 = por %p136_p10, %p54_p3  ;;  %p779_p12 = scmp.ge.s32.totalorder %s1191_s17, 1 }
  0x18   : > { %1463 = sst [smem:[#allocation20_spill]] %s1289_s26  ;;  %p143_p13 = scmp.lt.s32.totalorder %s1191_s17, 3 }
  0x19   : > { %s1464_s27 = scalar_select %p1291_p11, 1, 0 }
  0x1a   : > { %p1297_p0 = pnand %p779_p12, %p143_p13  ;;  %s1193_s29 = smov [#allocation6]  }
  0x1b   : > { %s158_s30 = sshll.u32 %s1193_s29, 4  ;;  %s159_s30 = int_to_ptr.vmem [resolvable:$true] %s158_s30 }
  0x1c   : > { %p964_p1 = pneg %p1297_p0  ;;  %s1062_s4 = scalar_lea.vmem %s159_s30, 4096 }
  0x1d   : > { %p1063_p3 = scmp.ne.s32.totalorder %s159_s30, %s1062_s4  ;;  %p1070_p11 = scmp.lt.s32.totalorder %s159_s30, %s159_s30 }
  0x1e   : > { %p965_p2 = pnand %p964_p1, %p55_p5  ;;  %p1071_p9 = scmp.lt.s32.totalorder %s1062_s4, %s1062_s4 }
  0x20   : > { %p1053_p6 = pneg %p965_p2  ;;  %p1072_p8 = por %p1071_p9, %p1070_p11 }
  0x22   : > { %p1065_p7 = pnand %p1063_p3, %p1053_p6 }
  0x24   : > { %p1066_p10 = pneg %p1065_p7 }
  0x26   : > { %p1073_p12 = pnand %p1072_p8, %p1066_p10 }
  0x28   : > { %1076 = shalt.err (!%p1073_p12)
}
  0x29   : > { %s1194_s5 = smov 128   ;;  %s1195_s6 = smov 8  }
  0x2a   : > { %s1466_s1 = sld [smem:[#allocation22_spill]]  ;;  %p781_p13 = scmp.ge.s32.totalorder %s1191_s17, 2 }
  0x2c   : > { %168 = sbr.rel (%p781_p13) target bundleno = 78 (0x4e), region = 20 }
  0x30   : > { %967 = dma.hbm_to_vmem [thread:$0]  (!%p965_p2), %s1466_s1, 4096, %s159_s30, [#allocation7], %s1194_s5, %s1194_s5, %s1195_s6  }
  0x31   : > { %s172_s9 = sand.u32 1, %s1191_s17   ;;  %s174_s10 = sand.u32 1, %s1179_s14  }
  0x32   : > { %s782_s11 = sshll.u32 %s174_s10, 7  ;;  %s808_s19 = sshll.u32 %s1187_s16, 10 }
  0x33   : > { %s949_s21 = scalar_select %p1270_p4, [#allocation0], [#allocation12] }
  0x34   : > { %s176_s23 = scalar_lea.vmem [#allocation3], %s782_s11  ;;  %s1196_s4 = smov 2048  }
  0x35   : > { %s196_s29 = sshll.u32 %s176_s23, 4  ;;  %s188_s30 = sld [smem:[%s949_s21]]   ;;  %s197_s29 = int_to_ptr.vmem [resolvable:$true] %s196_s29 }
  0x36   : > { %950 = sst [smem:[#allocation11]] (%p1270_p4), %s1196_s4  ;;  %s1197_s5 = smov 1024  }
  0x37   : > { %951 = sst [smem:[#allocation11 + $0x1]] (%p1270_p4), %s1197_s5  ;;  %s1198_s1 = smov 8  }
  0x38   : > { %s1467_s0 = sld [smem:[#allocation21_spill]]  ;;  %s1199_s20 = smov 128  }
  0x39   : > { %952 = sst [smem:[#allocation11 + $0x2]] (%p1270_p4), %s1198_s1  ;;  %s173_s23 = scalar_lea.sflag [#allocation4], %s172_s9 }
  0x3a   : > { %953 = sst [smem:[#allocation11 + $0x3]] (%p1270_p4), %s1199_s20  ;;  %s1200_s4 = smov 131072  }
  0x3b   : > { %954 = sst [smem:[#allocation11 + $0x4]] (%p1270_p4), %s1199_s20  ;;  %s785_s11 = sshll.u32 %s188_s30, 26 }
  0x3c   : > { %955 = sst [smem:[#allocation11 + $0x5]] (%p1270_p4), %s1198_s1  ;;  %s786_s21 = sadd.s32 134217728, %s785_s11 }
  0x3d   : > { %s787_s5 = sshll.u32 %s174_s10, 6  ;;  %s1201_s1 = smov [#allocation8]  }
  0x3e   : > { %s183_s8 = scalar_lea.hbm %s1467_s0, %s808_s19  ;;  %s229_s0 = scalar_lea.hbm %s1448_s2, %s808_s19 }
  0x3f   : > { %956 = dma.general (%p1270_p4), %s183_s8, 2048, %s197_s29, %s173_s23, %s1200_s4, [#allocation11], %s786_s21, 0  }
  0x40   : > { %s223_s16 = scalar_lea.vmem [#allocation8], %s787_s5  ;;  %s1093_s20 = sshll.u32 %s1201_s1, 4  ;;  %s1094_s20 = int_to_ptr.vmem [resolvable:$false] %s1093_s20 }
  0x41   : > { %s230_s26 = sshll.u32 %s223_s16, 4  ;;  %s1095_s9 = scalar_lea.vmem %s1094_s20, 2048  ;;  %s231_s26 = int_to_ptr.vmem [resolvable:$true] %s230_s26 }
  0x42   : > { %s1089_s14 = scalar_lea.vmem %s231_s26, 1024  ;;  %p1096_p1 = scmp.lt.s32.totalorder %s231_s26, %s1094_s20 }
  0x43   : > { %p1090_p8 = scmp.ne.s32.totalorder %s231_s26, %s1089_s14  ;;  %p1097_p2 = scmp.lt.s32.totalorder %s1095_s9, %s1089_s14 }
  0x45   : > { %p1091_p9 = pnand %p1090_p8, %p1270_p4  ;;  %p1098_p6 = por %p1097_p2, %p1096_p1 }
  0x47   : > { %p1092_p11 = pneg %p1091_p9 }
  0x49   : > { %p1099_p3 = pnand %p1098_p6, %p1092_p11 }
  0x4b   : > { %1102 = shalt.err (!%p1099_p3)
}
  0x4c   : > { %s1202_s10 = smov 128   ;;  %s1203_s19 = smov 8  }
  0x4d   : > { %957 = dma.hbm_to_vmem [thread:$0]  (%p1270_p4), %s229_s0, 1024, %s231_s26, %s173_s23, %s1202_s10, %s1202_s10, %s1203_s19  }
  0x4e PF: > { %242 = sbr.rel (%p1297_p0) target bundleno = 362 (0x16a), region = 32  ;;  %s244_s16 = sand.u32 (!%p1297_p0), 1, %s1258_s18  }
  0x4f   : > { %s1344_s29 = sand.u32 (!%p1297_p0), 1, %s1175_s13   ;;  %s245_s30 = scalar_lea.sflag (!%p1297_p0), [#allocation4], %s244_s16 }
  0x50   : > { %s791_s14 = sshll.u32 (!%p1297_p0), %s1344_s29, 7  ;;  %p1468_p7 = scmp.ne.s32.totalorder (!%p1297_p0), %s1461_s24, 0 }
  0x51   : > { %s1347_s8 = scalar_lea.vmem (!%p1297_p0), [#allocation3], %s791_s14 }
  0x53   : > { %1154 = dma.done.wait (%p1468_p7), %s245_s30, 2048  }
  0x54   : > { %1156 = vsyncadd (%p1468_p7), %s245_s30, 4294965248 }
  0x55   : > { %1158 = dma.done.wait (%p55_p5), [#allocation7], 4096  }
  0x56   : > { %1160 = vsyncadd (%p55_p5), [#allocation7], 4294963200  ;;  %s793_s0 = sshll.u32 %s1344_s29, 6 }
  0x57   : > { %s1360_s22 = scalar_lea.vmem [#allocation8], %s793_s0 }
  0x58   : > { %1162 = dma.done.wait (%p1468_p7), %s245_s30, 1024  }
  0x59   : > { %1164 = vsyncadd (%p1468_p7), %s245_s30, 4294966272  ;;  %v344_v0 = vld [vmem:[#allocation6 + $0x78] sm:$0xff]  ;;  %v343_v2 = vld [vmem:[#allocation6 + $0x70] sm:$0xff]  ;;  %s288_s18 = scalar_lea.vmem [#allocation9], %s793_s0  ;;  %s810_s24 = sshll.u32 %s1183_s15, 10 }
  0x5a   : > { %v499_v1 = vld [vmem:[#allocation6 + $0xf8] sm:$0xff]  ;;  %859 = vmatprep.subr.mxu0 %v344_v0  ;;  %v498_v3 = vld [vmem:[#allocation6 + $0xf0] sm:$0xff]  ;;  %v342_v4 = vld [vmem:[#allocation6 + $0x68] sm:$0xff]  ;;  %s662_s26 = sshll.u32 %s288_s18, 4  ;;  %s1396_s21 = scalar_lea.hbm %s1449_s3, %s810_s24  ;;  %s1398_s26 = int_to_ptr.vmem [resolvable:$true] %s662_s26 }
  0x5b   : > { %903 = vmatprep.subr.mxu1 %v499_v1  ;;  %860 = vmatpush3.msra.mxu0 %v344_v0  ;;  %v497_v5 = vld [vmem:[#allocation6 + $0xe8] sm:$0xff]  ;;  %v341_v6 = vld [vmem:[#allocation6 + $0x60] sm:$0xff]  ;;  %v340_v8 = vld [vmem:[#allocation6 + $0x58] sm:$0xff]  ;;  %s649_s23 = scalar_lea.sflag [#allocation5], %s1344_s29  ;;  %s1103_s4 = scalar_lea.vmem %s1398_s26, 1024 }
  0x5c   : > { %904 = vmatpush3.msra.mxu1 %v499_v1  ;;  %861 = vmatprep.subr.mxu0 %v343_v2  ;;  %v496_v7 = vld [vmem:[#allocation6 + $0xe0] sm:$0xff]  ;;  %v495_v9 = vld [vmem:[#allocation6 + $0xd8] sm:$0xff]  ;;  %v339_v10 = vld [vmem:[#allocation6 + $0x50] sm:$0xff]  ;;  %p1104_p4 = scmp.ne.s32.totalorder %s1398_s26, %s1103_s4  ;;  %p1469_p5 = scmp.ne.s32.totalorder %s1462_s25, 0 }
  0x5d   : > { %905 = vmatprep.subr.mxu1 %v498_v3  ;;  %862 = vmatpush3.msra.mxu0 %v343_v2  ;;  %v494_v11 = vld [vmem:[#allocation6 + $0xd0] sm:$0xff]  ;;  %v338_v12 = vld [vmem:[#allocation6 + $0x48] sm:$0xff]  ;;  %v337_v14 = vld [vmem:[#allocation6 + $0x40] sm:$0xff]  ;;  %s1204_s15 = smov [#allocation9]  }
  0x5e   : > { %906 = vmatpush3.msra.mxu1 %v498_v3  ;;  %863 = vmatprep.subr.mxu0 %v342_v4  ;;  %v493_v13 = vld [vmem:[#allocation6 + $0xc8] sm:$0xff]  ;;  %v492_v15 = vld [vmem:[#allocation6 + $0xc0] sm:$0xff]  ;;  %v336_v16 = vld [vmem:[#allocation6 + $0x38] sm:$0xff]  ;;  %p1105_p0 = pnand %p1104_p4, %p1469_p5  ;;  %s1107_s5 = sshll.u32 %s1204_s15, 4  ;;  %s1108_s5 = int_to_ptr.vmem [resolvable:$false] %s1107_s5 }
  0x5f   : > { %907 = vmatprep.subr.mxu1 %v497_v5  ;;  %864 = vmatpush3.msra.mxu0 %v342_v4  ;;  %v491_v17 = vld [vmem:[#allocation6 + $0xb8] sm:$0xff]  ;;  %v335_v18 = vld [vmem:[#allocation6 + $0x30] sm:$0xff]  ;;  %v334_v20 = vld [vmem:[#allocation6 + $0x28] sm:$0xff]  ;;  %s1109_s6 = scalar_lea.vmem %s1108_s5, 2048  ;;  %p1110_p12 = scmp.lt.s32.totalorder %s1398_s26, %s1108_s5 }
  0x60   : > { %908 = vmatpush3.msra.mxu1 %v497_v5  ;;  %865 = vmatprep.subr.mxu0 %v341_v6  ;;  %v490_v19 = vld [vmem:[#allocation6 + $0xb0] sm:$0xff]  ;;  %v489_v21 = vld [vmem:[#allocation6 + $0xa8] sm:$0xff]  ;;  %v333_v22 = vld [vmem:[#allocation6 + $0x20] sm:$0xff]  ;;  %p1106_p10 = pneg %p1105_p0  ;;  %p1111_p8 = scmp.lt.s32.totalorder %s1109_s6, %s1103_s4 }
  0x61   : > { %909 = vmatprep.subr.mxu1 %v496_v7  ;;  %866 = vmatpush3.msra.mxu0 %v341_v6  ;;  %v488_v23 = vld [vmem:[#allocation6 + $0xa0] sm:$0xff]  ;;  %v332_v24 = vld [vmem:[#allocation6 + $0x18] sm:$0xff]  ;;  %v331_v26 = vld [vmem:[#allocation6 + $0x10] sm:$0xff] }
  0x62   : > { %910 = vmatpush3.msra.mxu1 %v496_v7  ;;  %867 = vmatprep.subr.mxu0 %v340_v8  ;;  %v487_v25 = vld [vmem:[#allocation6 + $0x98] sm:$0xff]  ;;  %v486_v27 = vld [vmem:[#allocation6 + $0x90] sm:$0xff]  ;;  %v330_v28 = vld [vmem:[#allocation6 + $0x8] sm:$0xff]  ;;  %p1112_p9 = por %p1111_p8, %p1110_p12 }
  0x63   : > { %911 = vmatprep.subr.mxu1 %v495_v9  ;;  %868 = vmatpush3.msra.mxu0 %v340_v8  ;;  %v485_v29 = vld [vmem:[#allocation6 + $0x88] sm:$0xff]  ;;  %v329_v30 = vld [vmem:[#allocation6] sm:$0xff]  ;;  %v323_v36 = vld [vmem:[%s1347_s8 + $0x10] sm:$0xff] }
  0x64   : > { %912 = vmatpush3.msra.mxu1 %v495_v9  ;;  %869 = vmatprep.subr.mxu0 %v339_v10  ;;  %v484_v31 = vld [vmem:[#allocation6 + $0x80] sm:$0xff]  ;;  %v322_v34 = vld [vmem:[%s1347_s8 + $0x8] sm:$0xff]  ;;  %v797_v37 = vld [vmem:[%s1347_s8 + $0x50] sm:$0xff]  ;;  %p1113_p11 = pnand %p1112_p9, %p1106_p10 }
  0x65   : > { %913 = vmatprep.subr.mxu1 %v494_v11  ;;  %870 = vmatpush3.msra.mxu0 %v339_v10  ;;  %v321_v32 = vld [vmem:[%s1347_s8] sm:$0xff]  ;;  %v796_v35 = vld [vmem:[%s1347_s8 + $0x48] sm:$0xff]  ;;  %v324_v38 = vld [vmem:[%s1347_s8 + $0x18] sm:$0xff] }
  0x66   : > { %914 = vmatpush3.msra.mxu1 %v494_v11  ;;  %871 = vmatprep.subr.mxu0 %v338_v12  ;;  %v795_v33 = vld [vmem:[%s1347_s8 + $0x40] sm:$0xff]  ;;  %v798_v39 = vld [vmem:[%s1347_s8 + $0x58] sm:$0xff]  ;;  %v326_v42 = vld [vmem:[%s1347_s8 + $0x28] sm:$0xff] }
  0x67   : > { %915 = vmatprep.subr.mxu1 %v493_v13  ;;  %872 = vmatpush3.msra.mxu0 %v338_v12  ;;  %v325_v40 = vld [vmem:[%s1347_s8 + $0x20] sm:$0xff]  ;;  %v800_v43 = vld [vmem:[%s1347_s8 + $0x68] sm:$0xff]  ;;  %v327_v44 = vld [vmem:[%s1347_s8 + $0x30] sm:$0xff] }
  0x68   : > { %916 = vmatpush3.msra.mxu1 %v493_v13  ;;  %873 = vmatprep.subr.mxu0 %v337_v14  ;;  %v799_v41 = vld [vmem:[%s1347_s8 + $0x60] sm:$0xff]  ;;  %v801_v45 = vld [vmem:[%s1347_s8 + $0x70] sm:$0xff]  ;;  %v328_v46 = vld [vmem:[%s1347_s8 + $0x38] sm:$0xff] }
  0x69   : > { %917 = vmatprep.subr.mxu1 %v492_v15  ;;  %874 = vmatpush3.msra.mxu0 %v337_v14  ;;  %v802_v47 = vld [vmem:[%s1347_s8 + $0x78] sm:$0xff]  ;;  %v298_v48 = vld [vmem:[%s1360_s22 + $0x8] sm:$0xff]  ;;  %v297_v51 = vld [vmem:[%s1360_s22] sm:$0xff] }
  0x6a   : > { %918 = vmatpush3.msra.mxu1 %v492_v15  ;;  %875 = vmatprep.subr.mxu0 %v336_v16  ;;  %v300_v55 = vld [vmem:[%s1360_s22 + $0x18] sm:$0xff]  ;;  %v299_v60 = vld [vmem:[%s1360_s22 + $0x10] sm:$0xff]  ;;  %v302_v1 = vld [vmem:[%s1360_s22 + $0x28] sm:$0xff] }
  0x6b   : > { %919 = vmatprep.subr.mxu1 %v491_v17  ;;  %876 = vmatpush3.msra.mxu0 %v336_v16  ;;  %v301_v6 = vld [vmem:[%s1360_s22 + $0x20] sm:$0xff]  ;;  %v304_v11 = vld [vmem:[%s1360_s22 + $0x38] sm:$0xff]  ;;  %v303_v16 = vld [vmem:[%s1360_s22 + $0x30] sm:$0xff] }
  0x6c   : > { %920 = vmatpush3.msra.mxu1 %v491_v17  ;;  %877 = vmatprep.subr.mxu0 %v335_v18 }
  0x6d   : > { %921 = vmatprep.subr.mxu1 %v490_v19  ;;  %878 = vmatpush3.msra.mxu0 %v335_v18 }
  0x6e   : > { %922 = vmatpush3.msra.mxu1 %v490_v19  ;;  %879 = vmatprep.subr.mxu0 %v334_v20 }
  0x6f   : > { %923 = vmatprep.subr.mxu1 %v489_v21  ;;  %880 = vmatpush3.msra.mxu0 %v334_v20 }
  0x70   : > { %924 = vmatpush3.msra.mxu1 %v489_v21  ;;  %881 = vmatprep.subr.mxu0 %v333_v22 }
  0x71   : > { %925 = vmatprep.subr.mxu1 %v488_v23  ;;  %882 = vmatpush3.msra.mxu0 %v333_v22 }
  0x72   : > { %926 = vmatpush3.msra.mxu1 %v488_v23  ;;  %883 = vmatprep.subr.mxu0 %v332_v24 }
  0x73   : > { %927 = vmatprep.subr.mxu1 %v487_v25  ;;  %884 = vmatpush3.msra.mxu0 %v332_v24 }
  0x74   : > { %928 = vmatpush3.msra.mxu1 %v487_v25  ;;  %885 = vmatprep.subr.mxu0 %v331_v26 }
  0x75   : > { %929 = vmatprep.subr.mxu1 %v486_v27  ;;  %886 = vmatpush3.msra.mxu0 %v331_v26 }
  0x76   : > { %930 = vmatpush3.msra.mxu1 %v486_v27  ;;  %887 = vmatprep.subr.mxu0 %v330_v28 }
  0x77   : > { %931 = vmatprep.subr.mxu1 %v485_v29  ;;  %888 = vmatpush3.msra.mxu0 %v330_v28 }
  0x78   : > { %932 = vmatpush3.msra.mxu1 %v485_v29  ;;  %889 = vmatprep.subr.mxu0 %v329_v30 }
  0x79   : > { %933 = vmatprep.subr.mxu1 %v484_v31  ;;  %890 = vmatpush3.msra.mxu0 %v329_v30 }
  0x7a   : > { %891 = vmatprep.mubr.f32.mxu0 %v321_v32  ;;  %934 = vmatpush3.msra.mxu1 %v484_v31 }
  0x7b   : > { %935 = vmatprep.mubr.f32.mxu1 %v795_v33  ;;  %892 = vmatmul.mubr.f32.vlgmr.msra.gmra.mxu0 %v322_v34 }
  0x7c   : > { %936 = vmatmul.mubr.f32.vlgmr.msra.gmra.mxu1 %v796_v35  ;;  %894 = vmatprep.mubr.f32.mxu0 %v323_v36 }
  0x7d   : > { %938 = vmatprep.mubr.f32.mxu1 %v797_v37 }
  0x7f   : > { %895 = vmatmul.mubr.f32.gmra.mxu0 %v324_v38 }
  0x80   : > { %939 = vmatmul.mubr.f32.gmra.mxu1 %v798_v39  ;;  %897 = vmatprep.mubr.f32.mxu0 %v325_v40 }
  0x81   : > { %941 = vmatprep.mubr.f32.mxu1 %v799_v41 }
  0x83   : > { %898 = vmatmul.mubr.f32.gmra.mxu0 %v326_v42 }
  0x84   : > { %942 = vmatmul.mubr.f32.gmra.mxu1 %v800_v43  ;;  %900 = vmatprep.mubr.f32.mxu0 %v327_v44 }
  0x85   : > { %944 = vmatprep.mubr.f32.mxu1 %v801_v45 }
  0x87   : > { %901 = vmatmul.mubr.f32.gmra.mxu0 %v328_v46 }
  0x88   : > { %945 = vmatmul.mubr.f32.gmra.mxu1 %v802_v47 }
 0x13b   : > { %v893_v49 = vpop.f32.mrf.mxu0 }
 0x13c   : > { %v937_v50 = vpop.f32.mrf.mxu1  ;;  %v451_v52 = vadd.f32 %v893_v49, %v298_v48 }
 0x13d   : > { %v411_v53 = vpop.f32.mrf.mxu0 }
 0x13e   : > { %v566_v54 = vpop.f32.mrf.mxu1  ;;  %v606_v56 = vadd.f32 %v937_v50, %v451_v52  ;;  %v450_v57 = vadd.f32 %v411_v53, %v297_v51 }
 0x13f   : > { %v896_v58 = vpop.f32.mrf.mxu0 }
 0x140   : > { %v940_v59 = vpop.f32.mrf.mxu1  ;;  %1035 = vtanh.f32 %v606_v56  ;;  %v605_v61 = vadd.f32 %v566_v54, %v450_v57  ;;  %v453_v62 = vadd.f32 %v896_v58, %v300_v55 }
 0x141   : > { %v421_v63 = vpop.f32.mrf.mxu0 }
 0x142   : > { %v576_v0 = vpop.f32.mrf.mxu1  ;;  %1037 = vtanh.f32 %v605_v61  ;;  %v608_v2 = vadd.f32 %v940_v59, %v453_v62  ;;  %v452_v3 = vadd.f32 %v421_v63, %v299_v60 }
 0x143   : > { %v899_v4 = vpop.f32.mrf.mxu0 }
 0x144   : > { %v943_v5 = vpop.f32.mrf.mxu1  ;;  %1039 = vtanh.f32 %v608_v2  ;;  %v607_v7 = vadd.f32 %v576_v0, %v452_v3  ;;  %v455_v8 = vadd.f32 %v899_v4, %v302_v1 }
 0x145   : > { %v431_v9 = vpop.f32.mrf.mxu0 }
 0x146   : > { %v586_v10 = vpop.f32.mrf.mxu1  ;;  %1041 = vtanh.f32 %v607_v7  ;;  %v610_v12 = vadd.f32 %v943_v5, %v455_v8  ;;  %v454_v13 = vadd.f32 %v431_v9, %v301_v6 }
 0x147   : > { %v902_v14 = vpop.f32.mrf.mxu0 }
 0x148   : > { %v946_v15 = vpop.f32.mrf.mxu1  ;;  %1043 = vtanh.f32 %v610_v12  ;;  %v609_v17 = vadd.f32 %v586_v10, %v454_v13  ;;  %v457_v18 = vadd.f32 %v902_v14, %v304_v11 }
 0x149   : > { %v441_v19 = vpop.f32.mrf.mxu0 }
 0x14a   : > { %1045 = vtanh.f32 %v609_v17  ;;  %v612_v20 = vadd.f32 %v946_v15, %v457_v18  ;;  %v456_v21 = vadd.f32 %v441_v19, %v303_v16  ;;  %v596_v22 = vpop.f32.mrf.mxu1 }
 0x14c   : > { %1047 = vtanh.f32 %v612_v20  ;;  %v611_v23 = vadd.f32 %v596_v22, %v456_v21 }
 0x14d   : > { %v1036_v24 = vpop.eup %1035 }
 0x14e   : > { %641 = vst [vmem:[%s288_s18 + $0x8] sm:$0xff] %v1036_v24  ;;  %1049 = vtanh.f32 %v611_v23 }
 0x14f   : > { %v1038_v25 = vpop.eup %1037 }
 0x150   : > { %640 = vst [vmem:[%s288_s18] sm:$0xff] %v1038_v25 }
 0x151   : > { %v1040_v26 = vpop.eup %1039 }
 0x152   : > { %643 = vst [vmem:[%s288_s18 + $0x18] sm:$0xff] %v1040_v26 }
 0x153   : > { %v1042_v27 = vpop.eup %1041 }
 0x154   : > { %642 = vst [vmem:[%s288_s18 + $0x10] sm:$0xff] %v1042_v27 }
 0x155   : > { %v1044_v28 = vpop.eup %1043 }
 0x156   : > { %645 = vst [vmem:[%s288_s18 + $0x28] sm:$0xff] %v1044_v28 }
 0x157   : > { %v1046_v29 = vpop.eup %1045 }
 0x158   : > { %644 = vst [vmem:[%s288_s18 + $0x20] sm:$0xff] %v1046_v29 }
 0x159   : > { %v1048_v30 = vpop.eup %1047 }
 0x15a   : > { %647 = vst [vmem:[%s288_s18 + $0x38] sm:$0xff] %v1048_v30 }
 0x15b   : > { %v1050_v31 = vpop.eup %1049 }
 0x15c   : > { %646 = vst [vmem:[%s288_s18 + $0x30] sm:$0xff] %v1050_v31 }
 0x15d   : > { %1116 = shalt.err (!%p1113_p11)
}
 0x15e   : > { %s1117_s7 = scalar_lea.hbm %s1396_s21, 1024  ;;  %s1121_s9 = scalar_lea.hbm %s1449_s3, 2048 }
 0x15f   : > { %p1118_p1 = scmp.ne.s32.totalorder %s1396_s21, %s1117_s7  ;;  %p1122_p3 = scmp.lt.s32.totalorder %s1396_s21, %s1449_s3 }
 0x160   : > { %p1123_p7 = scmp.lt.s32.totalorder %s1121_s9, %s1117_s7 }
 0x161   : > { %p1119_p2 = pnand %p1118_p1, %p1469_p5 }
 0x162   : > { %p1124_p4 = por %p1123_p7, %p1122_p3 }
 0x163   : > { %p1120_p6 = pneg %p1119_p2 }
 0x165   : > { %p1125_p0 = pnand %p1124_p4, %p1120_p6 }
 0x167   : > { %1128 = shalt.err (!%p1125_p0)
}
 0x168   : > { %s1205_s16 = smov 128   ;;  %s1206_s14 = smov 8  }
 0x169   : > { %962 = dma.vmem_to_hbm [thread:$0]  (%p1469_p5), %s1398_s26, 1024, %s1396_s21, %s649_s23, %s1205_s16, %s1205_s16, %s1206_s14  }
 0x16a PF: > { %s677_s30 = sand.u32 1, %s1171_s12   ;;  %p1470_p10 = scmp.ne.s32.totalorder %s1464_s27, 0 }
 0x16b   : > { %s678_s8 = scalar_lea.sflag [#allocation5], %s677_s30 }
 0x16c   : > { %p969_p12 = pnand %p781_p13, %p1470_p10 }
 0x16e   : > { %p970_p8 = pneg %p969_p12 }
 0x170   : > { %1166 = dma.done.wait (%p970_p8), %s678_s8, 1024  }
 0x171   : > { %1168 = vsyncadd (%p970_p8), %s678_s8, 4294966272  ;;  %s20_s17 = sadd.s32 1, %s1191_s17   ;;  %s1471_s0 = sld [smem:[#allocation17_spill]] }
 0x172   : > { %p17_p9 = scmp.ge.s32.totalorder %s20_s17, 4   ;;  %s1472_s14 = sld [smem:[#allocation20_spill]] }
 0x173   : > { %s1473_s15 = sld [smem:[#allocation18_spill]]  ;;  %s1475_s12 = smov %s1175_s13 }
 0x174   : > { %s1474_s16 = sld [smem:[#allocation19_spill]]  ;;  %19 = sbr.rel (!%p17_p9) target bundleno = 10 (0xa), region = 108 }
 0x177   : > { %s1476_s13 = smov %s1471_s0 }
 0x179   :  { %683 = vsyncpa [#allocation4], 1 }
 0x17a   :  { %685 = vsyncpa [#allocation4 + $0x1], 1 }
 0x17b   :  { %686 = vsyncpa [#allocation7], 1 }
 0x17c   :  { %687 = vsyncpa [#allocation5], 1 }
 0x17d   :  { %689 = vsyncpa [#allocation5 + $0x1], 1 }

</bundles_post_ra>
